<compile_context>
chip_gen: v7x
topology: tpu7x:2x2x1
jax: 0.10.0
libtpu: 0.0.40
codegen_flags: <defaults>
</compile_context>

<pallas_src>
import jax
import jax.numpy as jnp
from jax.experimental import pallas as pl
from jax.experimental.pallas import tpu as pltpu

IN_FEATURES = 10
HIDDEN = 64


# ---------------------------------------------------------------------------
# Kernels
# ---------------------------------------------------------------------------
def attack_model_kernel_small(x_ref, w1_ref, b1_ref, w2_ref, b2_ref, o_ref):
    """Single-shot kernel for tiny batches: no grid, no pipeline setup."""
    # fc1 on the MXU, f32 accumulation.
    h = jnp.dot(x_ref[...], w1_ref[...], preferred_element_type=jnp.float32)
    h = jnp.maximum(h + b1_ref[...], 0.0)                          # ReLU
    # fc2 (out_features == 1): VPU multiply + cross-lane reduce; b2 from SMEM.
    y = jnp.sum(h * w2_ref[...], axis=-1) + b2_ref[0]              # (B,)
    # Lane-dense store: batch along the 128-lane axis of a (1, B) output.
    o_ref[...] = jax.nn.sigmoid(y)[None, :].astype(o_ref.dtype)


def attack_model_kernel_tiled(x_ref, w1_ref, b1_ref, w2_ref, b2_ref, o_ref):
    """Batch-tiled kernel: one (TB, 10) input tile -> one (1, TB) output tile."""
    h = jnp.dot(x_ref[...], w1_ref[...], preferred_element_type=jnp.float32)
    h = jnp.maximum(h + b1_ref[...], 0.0)
    y = jnp.sum(h * w2_ref[...], axis=-1) + b2_ref[0]              # (TB,)
    # Lane-dense writeback: one contiguous unmasked store instead of TB
    # single-lane masked stores into a (TB, 1) column.
    o_ref[...] = jax.nn.sigmoid(y)[None, :].astype(o_ref.dtype)    # (1, TB)


# ---------------------------------------------------------------------------
# Wrappers
# ---------------------------------------------------------------------------
def attack_model_forward_small(x, w1, b1, w2_row, b2):
    """No-grid path for small batches (everything fits in VMEM trivially)."""
    B = x.shape[0]
    out = pl.pallas_call(
        attack_model_kernel_small,
        out_shape=jax.ShapeDtypeStruct((1, B), jnp.float32),
        in_specs=[
            pl.BlockSpec(memory_space=pltpu.MemorySpace.VMEM),     # x
            pl.BlockSpec(memory_space=pltpu.MemorySpace.VMEM),     # w1
            pl.BlockSpec(memory_space=pltpu.MemorySpace.VMEM),     # b1
            pl.BlockSpec(memory_space=pltpu.MemorySpace.VMEM),     # w2 row
            pl.BlockSpec(memory_space=pltpu.MemorySpace.SMEM),     # b2 scalar
        ],
        out_specs=pl.BlockSpec(memory_space=pltpu.MemorySpace.VMEM),
    )(x, w1, b1, w2_row, b2)
    return out.reshape(B, 1)


def attack_model_forward_tiled(x, w1, b1, w2_row, b2, *, block_batch=512):
    """Batch-tiled path: grid over batch, weights VMEM-resident, lane-dense out.

    block_batch=512 keeps per-step overhead (~0.35 us/step) amortized while the
    (512, 10) f32 tile is only ~20 KiB — far inside the scoped VMEM limit even
    with double-buffering on v5e/v6e/v7x.
    """
    B = x.shape[0]
    grid_b = pl.cdiv(B, block_batch)
    B_pad = grid_b * block_batch
    if B_pad != B:
        x = jnp.pad(x, ((0, B_pad - B), (0, 0)))

    out = pl.pallas_call(
        attack_model_kernel_tiled,
        out_shape=jax.ShapeDtypeStruct((1, B_pad), jnp.float32),
        grid=(grid_b,),
        in_specs=[
            # x: one (TB, 10) tile per grid step; Pallas double-buffers it.
            pl.BlockSpec((block_batch, IN_FEATURES), lambda i: (i, 0)),
            # Weights / biases: constant index_map -> stay VMEM-resident.
            pl.BlockSpec((IN_FEATURES, HIDDEN), lambda i: (0, 0)),
            pl.BlockSpec((1, HIDDEN), lambda i: (0, 0)),
            pl.BlockSpec((1, HIDDEN), lambda i: (0, 0)),
            # b2: scalar in SMEM — avoids a padded (8,128) VMEM tile + DMA.
            pl.BlockSpec(memory_space=pltpu.MemorySpace.SMEM),
        ],
        out_specs=pl.BlockSpec((1, block_batch), lambda i: (0, i)),
        compiler_params=pltpu.CompilerParams(
            # Independent batch tiles: lets v7x shard grid steps across both
            # TensorCores (no-op on single-core v5e/v6e).
            dimension_semantics=("parallel",),
        ),
    )(x, w1, b1, w2_row, b2)
    return out.reshape(B_pad, 1)[:B]


def attack_model_forward(x, w1, b1, w2_row, b2, *, block_batch=512):
    if x.shape[0] <= block_batch:
        return attack_model_forward_small(x, w1, b1, w2_row, b2)
    return attack_model_forward_tiled(x, w1, b1, w2_row, b2,
                                      block_batch=block_batch)


# ---------------------------------------------------------------------------
# Helpers
# ---------------------------------------------------------------------------
def init_params(key):
    # Mimics PyTorch nn.Linear default init: U(-1/sqrt(fan_in), +1/sqrt(fan_in)).
    k1, k2, k3, k4 = jax.random.split(key, 4)
    bound1 = 1.0 / jnp.sqrt(float(IN_FEATURES))
    bound2 = 1.0 / jnp.sqrt(float(HIDDEN))
    w1 = jax.random.uniform(k1, (IN_FEATURES, HIDDEN), jnp.float32, -bound1, bound1)
    b1 = jax.random.uniform(k2, (1, HIDDEN), jnp.float32, -bound1, bound1)
    w2_row = jax.random.uniform(k3, (1, HIDDEN), jnp.float32, -bound2, bound2)
    b2 = jax.random.uniform(k4, (1,), jnp.float32, -bound2, bound2)
    return w1, b1, w2_row, b2


def reference_forward(x, w1, b1, w2_row, b2):
    h = jnp.maximum(x @ w1 + b1, 0.0)
    return jax.nn.sigmoid(h @ w2_row.T + b2)


# ---------------------------------------------------------------------------
# Example / self-check
# ---------------------------------------------------------------------------
if __name__ == "__main__":
    key = jax.random.PRNGKey(0)
    k_params, k_x_small, k_x_big = jax.random.split(key, 3)
    w1, b1, w2_row, b2 = init_params(k_params)

    # --- tiny-batch path (no grid, lane-dense output) -----------------------
    x_small = jax.random.normal(k_x_small, (8, IN_FEATURES), dtype=jnp.float32)
    out_small = jax.block_until_ready(
        attack_model_forward(x_small, w1, b1, w2_row, b2))
    ref_small = reference_forward(x_small, w1, b1, w2_row, b2)
    assert out_small.shape == (8, 1)
    assert jnp.allclose(out_small, ref_small, atol=1e-5, rtol=1e-5)

    # --- batch-tiled path (grid over batch, padding exercised) --------------
    batch = 300  # non-multiple of the 128-row tile to exercise padding
    x_big = jax.random.normal(k_x_big, (batch, IN_FEATURES), dtype=jnp.float32)
    out_big = jax.block_until_ready(
        attack_model_forward(x_big, w1, b1, w2_row, b2, block_batch=128))
    ref_big = reference_forward(x_big, w1, b1, w2_row, b2)
    assert out_big.shape == (batch, 1)
    assert jnp.allclose(out_big, ref_big, atol=1e-5, rtol=1e-5)

    print("KERNEL_OK")
</pallas_src>

<mosaic_0001>
module attributes {stable_mosaic.version = 11 : i64} {
  func.func @attack_model_kernel_small(%arg0: memref<8x10xf32, #tpu.memory_space<vmem>>, %arg1: memref<10x64xf32, #tpu.memory_space<vmem>>, %arg2: memref<1x64xf32, #tpu.memory_space<vmem>>, %arg3: memref<1x64xf32, #tpu.memory_space<vmem>>, %arg4: memref<1xf32, #tpu.memory_space<smem>>, %arg5: memref<1x8xf32, #tpu.memory_space<vmem>>) attributes {dimension_semantics = [], scalar_prefetch = 0 : i64, scratch_operands = 0 : i64, tpu.core_type = #tpu.core_type<tc>} {
    %c0 = arith.constant 0 : index
    %c0_0 = arith.constant 0 : index
    %0 = vector.load %arg0[%c0, %c0_0] : memref<8x10xf32, #tpu.memory_space<vmem>>, vector<8x10xf32>
    %c0_1 = arith.constant 0 : index
    %c0_2 = arith.constant 0 : index
    %1 = vector.load %arg1[%c0_1, %c0_2] : memref<10x64xf32, #tpu.memory_space<vmem>>, vector<10x64xf32>
    %cst = arith.constant dense<0.000000e+00> : vector<8x64xf32>
    %2 = tpu.matmul %0, %1, %cst {dimension_numbers = #tpu.dot_dimension_numbers<[1], [0], [0], [1], [0, 0, 1, 1], [], []>} : vector<8x10xf32>, vector<10x64xf32>, vector<8x64xf32> -> vector<8x64xf32>
    %c0_3 = arith.constant 0 : index
    %c0_4 = arith.constant 0 : index
    %3 = vector.load %arg2[%c0_3, %c0_4] : memref<1x64xf32, #tpu.memory_space<vmem>>, vector<1x64xf32>
    %4 = vector.broadcast %3 : vector<1x64xf32> to vector<8x64xf32>
    %5 = arith.addf %2, %4 : vector<8x64xf32>
    %cst_5 = arith.constant 0.000000e+00 : f32
    %6 = vector.broadcast %cst_5 : f32 to vector<8x64xf32>
    %7 = arith.maximumf %5, %6 : vector<8x64xf32>
    %c0_6 = arith.constant 0 : index
    %c0_7 = arith.constant 0 : index
    %8 = vector.load %arg3[%c0_6, %c0_7] : memref<1x64xf32, #tpu.memory_space<vmem>>, vector<1x64xf32>
    %9 = vector.broadcast %8 : vector<1x64xf32> to vector<8x64xf32>
    %10 = arith.mulf %7, %9 : vector<8x64xf32>
    %cst_8 = arith.constant dense<0.000000e+00> : vector<8xf32>
    %11 = vector.multi_reduction <add>, %10, %cst_8 [1] : vector<8x64xf32> to vector<8xf32>
    %c0_9 = arith.constant 0 : index
    %12 = memref.load %arg4[%c0_9] : memref<1xf32, #tpu.memory_space<smem>>
    %13 = vector.broadcast %12 : f32 to vector<8xf32>
    %14 = arith.addf %11, %13 : vector<8xf32>
    %15 = arith.negf %14 : vector<8xf32>
    %16 = math.exp %15 : vector<8xf32>
    %cst_10 = arith.constant 1.000000e+00 : f32
    %17 = vector.broadcast %cst_10 : f32 to vector<8xf32>
    %18 = arith.addf %17, %16 : vector<8xf32>
    %19 = arith.divf %17, %18 : vector<8xf32>
    %20 = vector.shape_cast %19 : vector<8xf32> to vector<1x8xf32>
    %c0_11 = arith.constant 0 : index
    %c0_12 = arith.constant 0 : index
    %21 = vector.load %arg5[%c0_11, %c0_12] : memref<1x8xf32, #tpu.memory_space<vmem>>, vector<1x8xf32>
    tpu.vector_store %arg5[%c0_11, %c0_12], %20 {strides = array<i32>} : memref<1x8xf32, #tpu.memory_space<vmem>>, vector<1x8xf32>,
    return
  }
}

</mosaic_0001>

<bundles_post_ra>
// kernel: tpu_custom_call.1
= control target key start
LH: loop header
LB: loop body
LE: loop exit
PB: predicated region body
PF: predicated region fallthrough
CT: control target
= control target key end

     0   :  { %11 = vsyncpa [#allocation4], 0  ;;  %s379_s0 = inlined_call_operand.hbm [shape: f32[8,10], index: 0, kind: input, shape index: {}]   ;;  %s380_s1 = inlined_call_operand.hbm [shape: f32[10,64], index: 1, kind: input, shape index: {}]   ;;  %s381_s2 = inlined_call_operand.vmem [shape: f32[1,64], index: 2, kind: input, shape index: {}]   ;;  %s382_s3 = inlined_call_operand.vmem [shape: f32[1,64], index: 3, kind: input, shape index: {}]   ;;  %s383_s4 = inlined_call_operand.<no memory space> [shape: f32[1], index: 4, kind: input, shape index: {}]   ;;  %s384_s5 = inlined_call_operand.hbm [shape: f32[1,8], index: 5, kind: output, shape index: {}]  }
   0x1   :  { %12 = vsyncpa [#allocation7], 0 }
   0x2   :  { %13 = vsyncpa [#allocation5], 0  ;;  %s288_s18 = smov [#allocation3]   ;;  %s289_s20 = smov [#allocation6]  }
   0x3   :  { %s20_s19 = sshll.u32 %s288_s18, 4  ;;  %s29_s21 = sshll.u32 %s289_s20, 4  ;;  %s21_s19 = int_to_ptr.vmem [resolvable:$true] %s20_s19  ;;  %s327_s21 = int_to_ptr.vmem [resolvable:$true] %s29_s21 }
   0x4   :  { %s216_s24 = scalar_lea.hbm %s379_s0, 128 }
   0x5   :  { %p217_p0 = scmp.ne.s32.totalorder %s379_s0, %s216_s24  ;;  %p220_p1 = scmp.lt.u32.totalorder %s216_s24, %s379_s0 }
   0x7   :  { %p222_p2 = pnand %p220_p1, %p217_p0 }
   0x9   :  { %225 = shalt.err (!%p222_p2)
}
   0xa   :  { %s226_s29 = scalar_lea.vmem %s21_s19, 128  ;;  %p231_p4 = scmp.lt.s32.totalorder %s21_s19, %s21_s19 }
   0xb   :  { %p227_p3 = scmp.ne.s32.totalorder %s21_s19, %s226_s29  ;;  %p232_p5 = scmp.lt.s32.totalorder %s226_s29, %s226_s29 }
   0xd   :  { %p233_p6 = por %p232_p5, %p231_p4 }
   0xf   :  { %p234_p7 = pnand %p233_p6, %p227_p3 }
  0x11   :  { %237 = shalt.err (!%p234_p7)
}
  0x12   :  { %23 = dma.hbm_to_vmem [thread:$0]  %s379_s0, 128, %s21_s19, [#allocation4]  }
  0x13   :  { %s238_s9 = scalar_lea.hbm %s380_s1, 256 }
  0x14   :  { %p239_p8 = scmp.ne.s32.totalorder %s380_s1, %s238_s9  ;;  %p242_p9 = scmp.lt.u32.totalorder %s238_s9, %s380_s1 }
  0x16   :  { %p244_p10 = pnand %p242_p9, %p239_p8 }
  0x18   :  { %247 = shalt.err (!%p244_p10)
}
  0x19   :  { %s248_s14 = scalar_lea.vmem %s327_s21, 256  ;;  %p253_p12 = scmp.lt.s32.totalorder %s327_s21, %s327_s21 }
  0x1a   :  { %p249_p11 = scmp.ne.s32.totalorder %s327_s21, %s248_s14  ;;  %p254_p13 = scmp.lt.s32.totalorder %s248_s14, %s248_s14 }
  0x1c   :  { %p255_p0 = por %p254_p13, %p253_p12 }
  0x1e   :  { %p256_p1 = pnand %p255_p0, %p249_p11 }
  0x20   :  { %259 = shalt.err (!%p256_p1)
}
  0x21   :  { %s290_s0 = smov 128   ;;  %s291_s15 = smov 8  }
  0x22   :  { %35 = dma.hbm_to_vmem [thread:$0]  %s380_s1, 256, %s327_s21, [#allocation7], %s290_s0, %s290_s0, %s291_s15  }
  0x23   :  { %282 = dma.done.wait [#allocation4], 128  }
  0x24   :  { %283 = vsyncadd [#allocation4], 4294967168 }
  0x25   :  { %284 = dma.done.wait [#allocation7], 256  }
  0x26   :  { %285 = vsyncadd [#allocation7], 4294967040  ;;  %v292_v0 = vmov 0.0|0.0   ;;  %vm293_vm0 = vmmov 0   ;;  %v294_v1 = vmov 0.0   ;;  %vm62_vm1 = vcmask 1041408  }
  0x27   :  { %199 = vmatprep.subr.bf16.mxu0 %v292_v0  ;;  %196 = vmatprep.mubr.msk.f32.mxu0 %vm293_vm0, %v294_v1  ;;  %v49_v2 = vld [vmem:[#allocation6] sm:$0xff]  ;;  %v50_v3 = vld [vmem:[#allocation6 + $0x8] sm:$0x3]  ;;  %vm295_vm2 = vmmov 1   ;;  %v48_v5 = vld [vmem:[#allocation3] sm:$0xff]  ;;  %vm58_vm4 = vcmask 80896   ;;  %v150_v14 = vstv %s383_s4  ;;  %v159_v20 = vlaneseq }
  0x28   :  { %vm201_vm3 = vmpackc.low %vm62_vm1, %vm295_vm2  ;;  %v200_v4 = vpack.c.bf16 %v50_v3, %v49_v2  ;;  %v184_v6 = vld [vmem:[%s381_s2] ss:$0 sm:$0xff]  ;;  %vm145_vm5 = vcmask 523264   ;;  %s296_s2 = smov [#allocation8]   ;;  %vm166_vm6 = vcmask 57344  }
  0x29   :  { %v187_v10 = vld [vmem:[%s382_s3] ss:$0 sm:$0xff]  ;;  %v160_v21 = vand.u32 127, %v159_v20  ;;  %v162_v22 = vshrl.u32 %v159_v20, 7  ;;  %s174_s3 = sshll.u32 %s296_s2, 4  ;;  %s175_s3 = int_to_ptr.vmem [resolvable:$true] %s174_s3 }
  0x2a   :  { %202 = vmatpush3.bf16.msk.msra.mxu0 %vm201_vm3, %v200_v4  ;;  %s260_s23 = scalar_lea.vmem %s175_s3, 16  ;;  %s264_s4 = scalar_lea.vmem %s175_s3, 32 }
  0x2b   :  { %v163_v23 = vsub.s32 %v160_v21, %v162_v22  ;;  %p261_p2 = scmp.ne.s32.totalorder %s175_s3, %s260_s23  ;;  %p265_p3 = scmp.lt.s32.totalorder %s175_s3, %s175_s3 }
  0x2c   :  { %p266_p4 = scmp.lt.s32.totalorder %s264_s4, %s260_s23 }
  0x2d   :  { %197 = vmatmul.mubr.msk.f32.vlgmr.msra.gmra.mrb[0].mxu0 %vm58_vm4, %v48_v5 }
  0x2e   :  { %p267_p5 = por %p266_p4, %p265_p3 }
  0x30   :  { %p268_p6 = pnand %p267_p5, %p261_p2 }
 0x100   :  { %v132_v7 = vpop.f32.mrb[0].mxu0 }
 0x101   :  { %v133_v8 = vadd.f32 %v184_v6, %v132_v7  ;;  %v198_v9 = vpop.f32.mrb[1].mxu0 }
 0x103   :  { %v136_v11 = vmax.f32 %v133_v8, 0.0 }
 0x105   :  { %v144_v12 = vmul.f32 %v187_v10, %v136_v11 }
 0x107   :  { %v146_v13 = vsel %vm145_vm5, %v144_v12, 0.0 }
 0x108   :  { %147 = vadd.xlane.f32.xlu0 %v146_v13 }
 0x195   :  { %v148_v15 = vpop.xlane.xlu0 %147 }
 0x196   :  { %v151_v16 = vadd.f32 %v150_v14, %v148_v15 }
 0x198   :  { %v188_v17 = vmul.f32 -1.442695, %v151_v16 }
 0x19a   :  { %212 = vpow2.f32 %v188_v17 }
 0x1a4   :  { %v213_v18 = vpop.eup %212 }
 0x1a5   :  { %v155_v19 = vadd.f32 1.0, %v213_v18 }
 0x1a7   :  { %214 = vrcp.f32 %v155_v19 }
 0x1b1   :  { %v215_v24 = vpop.eup %214 }
 0x1b2   :  { %v164_v25 = vrot.slane %v215_v24, %v163_v23 }
 0x1b4   :  { %167 = vst.msk [vmem:[#allocation8] sm:$0x1] %vm166_vm6, %v164_v25 }
 0x1b5   :  { %271 = shalt.err (!%p268_p6)
}
 0x1b6   :  { %s272_s26 = scalar_lea.hbm %s384_s5, 16 }
 0x1b7   :  { %p273_p7 = scmp.ne.s32.totalorder %s384_s5, %s272_s26  ;;  %p276_p8 = scmp.lt.u32.totalorder %s272_s26, %s384_s5 }
 0x1b9   :  { %p278_p9 = pnand %p276_p8, %p273_p7 }
 0x1bb   :  { %281 = shalt.err (!%p278_p9)
}
 0x1bc   :  { %177 = dma.vmem_to_hbm [thread:$0]  %s175_s3, 16, %s384_s5, [#allocation5]  }
 0x1bd   :  { %286 = dma.done.wait [#allocation5], 16  }
 0x1be   :  { %287 = vsyncadd [#allocation5], 4294967280 }
 0x1bf   :  { %181 = vsyncpa [#allocation4], 1 }
 0x1c0   :  { %182 = vsyncpa [#allocation7], 1 }
 0x1c1   :  { %183 = vsyncpa [#allocation5], 1 }

</bundles_post_ra>
